<compile_context>
chip_gen: v7x
topology: tpu7x:2x2x1
jax: 0.10.0
libtpu: 0.0.40
codegen_flags: <defaults>
</compile_context>

<pallas_src>
import functools
import math

import jax
import jax.numpy as jnp
from jax import lax
from jax.experimental import pallas as pl
from jax.experimental.pallas import tpu as pltpu


_ROW_TILE = 512    # adj row-block rows (multiple of 8); amortizes per-step overhead
_COL_TILE = 2048   # adj column (K) tile (multiple of 128); bounds per-step VMEM


def _vmem_limit_bytes() -> int:
    """Generation-aware scoped-VMEM limit (~70% of physical capacity)."""
    try:
        cap = int(pltpu.get_tpu_info().vmem_capacity_bytes)
    except Exception:  # interpret mode / API drift: fall back to v7x-sized VMEM
        cap = 64 * 1024 * 1024
    return max(32 * 1024 * 1024, int(cap * 0.7))


def _row_tile(n: int) -> int:
    return n if n <= _ROW_TILE else _ROW_TILE


def _col_tile(n: int) -> int:
    return n if n <= _COL_TILE else _COL_TILE


def _use_fused(n, f, h, o2, adj_itemsize, vmem_limit) -> bool:
    """True when the whole old-node branch fits one VMEM-resident kernel."""
    est = (adj_itemsize + 2) * n * n        # adj input buffer + in-kernel bf16 copy
    est += 4 * n * (f + 2 * h + 2 * o2)     # x, x@W1, hidden, s_cat, z temporaries
    est += 4 * (f * h + h * o2)             # weights
    est += 8 << 20                          # Mosaic internal scratch headroom
    return est <= vmem_limit


# --------------------------------------------------------------------------- #
# Kernels
# --------------------------------------------------------------------------- #
def _fused_old_kernel(adj_ref, x_ref, w1_ref, wcat_ref, z_ref, *, cdt):
    """Whole old-node branch with every operand VMEM-resident (adj read once)."""
    adj = adj_ref[...].astype(cdt)                       # in-kernel cast, no XLA pass
    xw1 = jnp.dot(x_ref[...].astype(cdt), w1_ref[...].astype(cdt),
                  preferred_element_type=jnp.float32)    # reference order: X @ W1 first
    hidden = jnp.maximum(
        jnp.dot(adj, xw1.astype(cdt), preferred_element_type=jnp.float32), 0.0)
    s_cat = jnp.dot(hidden.astype(cdt), wcat_ref[...].astype(cdt),
                    preferred_element_type=jnp.float32)
    z_ref[...] = jnp.dot(adj, s_cat.astype(cdt),
                         preferred_element_type=jnp.float32).astype(z_ref.dtype)


def _xw_kernel(x_ref, w1_ref, xw_ref, *, cdt):
    """Streaming-path prologue: XW1 = x @ W1 (stored bf16, O(N*F*H) work)."""
    xw_ref[...] = jnp.dot(x_ref[...].astype(cdt), w1_ref[...].astype(cdt),
                          preferred_element_type=jnp.float32).astype(xw_ref.dtype)


def _mask_k_tail(blk, valid, axis):
    """Zero the ragged tail of a streamed block along the K dimension `axis`."""
    idx = lax.broadcasted_iota(jnp.int32, blk.shape, axis)
    return jnp.where(idx < valid, blk, jnp.zeros_like(blk))


def _stage_a_kernel(adj_ref, xw1_ref, wcat_ref, s_ref, acc_ref, *, n, tk, cdt, mask):
    """s_cat row-block = relu(sum_k adj[i,k] @ XW1[k]) @ [W_mean | W_logstd]."""
    k = pl.program_id(1)

    @pl.when(k == 0)
    def _init():
        acc_ref[...] = jnp.zeros_like(acc_ref)

    adj_blk = adj_ref[...].astype(cdt)                   # per-block bf16 cast
    xw1_blk = xw1_ref[...]
    if mask:                                             # static: only if n % tk != 0
        valid = n - k * tk
        adj_blk = _mask_k_tail(adj_blk, valid, 1)
        xw1_blk = _mask_k_tail(xw1_blk, valid, 0)
    acc_ref[...] += jnp.dot(adj_blk, xw1_blk, preferred_element_type=jnp.float32)

    @pl.when(k == pl.num_programs(1) - 1)
    def _finalize():
        hidden = jnp.maximum(acc_ref[...], 0.0)          # relu stays in f32
        s_ref[...] = jnp.dot(hidden.astype(cdt), wcat_ref[...].astype(cdt),
                             preferred_element_type=jnp.float32).astype(s_ref.dtype)


def _stage_b_kernel(adj_ref, s_ref, z_ref, acc_ref, *, n, tk, cdt, mask):
    """z row-block = sum_k adj[i,k] @ s_cat[k]  (second neighborhood aggregation)."""
    k = pl.program_id(1)

    @pl.when(k == 0)
    def _init():
        acc_ref[...] = jnp.zeros_like(acc_ref)

    adj_blk = adj_ref[...].astype(cdt)
    s_blk = s_ref[...].astype(cdt)
    if mask:
        valid = n - k * tk
        adj_blk = _mask_k_tail(adj_blk, valid, 1)
        s_blk = _mask_k_tail(s_blk, valid, 0)
    acc_ref[...] += jnp.dot(adj_blk, s_blk, preferred_element_type=jnp.float32)

    @pl.when(k == pl.num_programs(1) - 1)
    def _finalize():
        z_ref[...] = acc_ref[...].astype(z_ref.dtype)


def _dense_project_kernel(x_ref, w1_ref, wcat_ref, z_ref, *, cdt):
    """New-node branch (adj == I): z = relu(x_new @ W1) @ [W_mean | W_logstd]."""
    hidden = jnp.maximum(
        jnp.dot(x_ref[...].astype(cdt), w1_ref[...].astype(cdt),
                preferred_element_type=jnp.float32), 0.0)
    z_ref[...] = jnp.dot(hidden.astype(cdt), wcat_ref[...].astype(cdt),
                         preferred_element_type=jnp.float32).astype(z_ref.dtype)


# --------------------------------------------------------------------------- #
# Wrappers
# --------------------------------------------------------------------------- #
def _fused_old_branch(adj, x, w1, wcat, cdt, vmem_limit):
    n, _ = x.shape
    o2 = wcat.shape[1]
    # No grid: all operands land in VMEM once; adj read from HBM exactly once.
    return pl.pallas_call(
        functools.partial(_fused_old_kernel, cdt=cdt),
        out_shape=jax.ShapeDtypeStruct((n, o2), jnp.float32),
        compiler_params=pltpu.CompilerParams(vmem_limit_bytes=vmem_limit),
    )(adj, x, w1, wcat)


def _streaming_old_branch(adj, x, w1, wcat, cdt, vmem_limit, tm, tk):
    n, f = x.shape
    h = w1.shape[1]
    o2 = wcat.shape[1]
    nm, nk = pl.cdiv(n, tm), pl.cdiv(n, tk)
    mask = (n % tk) != 0
    cparams = pltpu.CompilerParams(
        dimension_semantics=("parallel", "arbitrary"),   # rows shard across TCs
        vmem_limit_bytes=vmem_limit)

    # Prologue: XW1 = x @ W1 once (tiny vs the two N^2 adjacency streams).
    xw1 = pl.pallas_call(
        functools.partial(_xw_kernel, cdt=cdt),
        grid=(nm,),
        in_specs=[pl.BlockSpec((tm, f), lambda i: (i, 0)),
                  pl.BlockSpec((f, h), lambda i: (0, 0))],
        out_specs=pl.BlockSpec((tm, h), lambda i: (i, 0)),
        out_shape=jax.ShapeDtypeStruct((n, h), cdt),
        compiler_params=pltpu.CompilerParams(
            dimension_semantics=("parallel",), vmem_limit_bytes=vmem_limit),
    )(x, w1)

    # Stage A: stream (tm, tk) adj tiles, accumulate adj @ XW1 in an f32 scratch,
    # project through Wcat at the last K block.  s_cat kept in f32 (tiny traffic).
    s_cat = pl.pallas_call(
        functools.partial(_stage_a_kernel, n=n, tk=tk, cdt=cdt, mask=mask),
        grid=(nm, nk),
        in_specs=[pl.BlockSpec((tm, tk), lambda i, k: (i, k)),
                  pl.BlockSpec((tk, h), lambda i, k: (k, 0)),
                  pl.BlockSpec((h, o2), lambda i, k: (0, 0))],
        out_specs=pl.BlockSpec((tm, o2), lambda i, k: (i, 0)),
        out_shape=jax.ShapeDtypeStruct((n, o2), jnp.float32),
        scratch_shapes=[pltpu.VMEM((tm, h), jnp.float32)],
        compiler_params=cparams,
    )(adj, xw1, wcat)

    # Stage B: second aggregation, same K-tiled structure.
    z_cat = pl.pallas_call(
        functools.partial(_stage_b_kernel, n=n, tk=tk, cdt=cdt, mask=mask),
        grid=(nm, nk),
        in_specs=[pl.BlockSpec((tm, tk), lambda i, k: (i, k)),
                  pl.BlockSpec((tk, o2), lambda i, k: (k, 0))],
        out_specs=pl.BlockSpec((tm, o2), lambda i, k: (i, 0)),
        out_shape=jax.ShapeDtypeStruct((n, o2), jnp.float32),
        scratch_shapes=[pltpu.VMEM((tm, o2), jnp.float32)],
        compiler_params=cparams,
    )(adj, s_cat)
    return z_cat


def _gcn_new_branch(x_new, w1, wcat, cdt, vmem_limit):
    m, f = x_new.shape
    h = w1.shape[1]
    o2 = wcat.shape[1]
    tm = _row_tile(m)
    return pl.pallas_call(
        functools.partial(_dense_project_kernel, cdt=cdt),
        grid=(pl.cdiv(m, tm),),
        in_specs=[pl.BlockSpec((tm, f), lambda i: (i, 0)),
                  pl.BlockSpec((f, h), lambda i: (0, 0)),
                  pl.BlockSpec((h, o2), lambda i: (0, 0))],
        out_specs=pl.BlockSpec((tm, o2), lambda i: (i, 0)),
        out_shape=jax.ShapeDtypeStruct((m, o2), jnp.float32),
        compiler_params=pltpu.CompilerParams(
            dimension_semantics=("parallel",), vmem_limit_bytes=vmem_limit),
    )(x_new, w1, wcat)


def recursive_graph_convolution_step(params, adj, x, x_new=None, *,
                                     compute_dtype=jnp.bfloat16,
                                     streaming=None, row_tile=None, col_tile=None):
    """Mirrors RecursiveGraphConvolutionStep.forward (eval mode).

    adj may be f32 or already bf16 (kernels cast per block, never in XLA).
    streaming=None -> the fused single-kernel path is chosen automatically
    whenever adj fits the per-generation VMEM budget (adj read from HBM once);
    otherwise (or if streaming=True) the K-tiled streaming path is used.
    """
    w1, w_mean, w_log_std = params
    out_dim = w_mean.shape[1]
    wcat = jnp.concatenate([w_mean, w_log_std], axis=1)   # [H, 2*O]

    n, f = x.shape
    h = w1.shape[1]
    o2 = 2 * out_dim
    vmem_limit = _vmem_limit_bytes()

    if streaming is None:
        streaming = not _use_fused(n, f, h, o2, adj.dtype.itemsize, vmem_limit)

    if streaming:
        tm = row_tile if row_tile is not None else _row_tile(n)
        tk = col_tile if col_tile is not None else _col_tile(n)
        z_cat = _streaming_old_branch(adj, x, w1, wcat, compute_dtype,
                                      vmem_limit, tm, tk)
    else:
        z_cat = _fused_old_branch(adj, x, w1, wcat, compute_dtype, vmem_limit)

    z_mean_old, z_log_std_old = z_cat[:, :out_dim], z_cat[:, out_dim:]

    if x_new is not None:
        # adj_new == I  =>  z_new = relu(x_new @ W1) @ W_cat; no identity matrix
        # is materialised and no identity matmuls / extra adj DMA are issued.
        z_cat_new = _gcn_new_branch(x_new, w1, wcat, compute_dtype, vmem_limit)
        return (z_mean_old, z_log_std_old,
                z_cat_new[:, :out_dim], z_cat_new[:, out_dim:])
    return z_mean_old, z_log_std_old


def xavier_uniform(key, fan_in, fan_out):
    bound = math.sqrt(6.0 / (fan_in + fan_out))
    return jax.random.uniform(key, (fan_in, fan_out), dtype=jnp.float32,
                              minval=-bound, maxval=bound)


if __name__ == "__main__":
    features_dim, hidden_dim, out_dim = 32, 64, 16
    n_nodes, n_new = 16, 8

    key = jax.random.PRNGKey(0)
    k_w1, k_wm, k_ws, k_adj, k_x, k_xn, k_adj2, k_x2 = jax.random.split(key, 8)

    # Deterministic parameter init (xavier_uniform, as in reset_parameters).
    w1 = xavier_uniform(k_w1, features_dim, hidden_dim)
    w_mean = xavier_uniform(k_wm, hidden_dim, out_dim)
    w_log_std = xavier_uniform(k_ws, hidden_dim, out_dim)
    params = (w1, w_mean, w_log_std)

    def make_graph(ka, kx, n):
        a_raw = (jax.random.uniform(ka, (n, n)) > 0.7).astype(jnp.float32)
        a_sym = jnp.minimum(a_raw + a_raw.T + jnp.eye(n, dtype=jnp.float32), 1.0)
        adj_ = a_sym / jnp.sum(a_sym, axis=1, keepdims=True)   # row-normalized, f32
        x_ = jax.random.normal(kx, (n, features_dim), dtype=jnp.float32)
        return adj_, x_

    def ref(adj_, x_):
        hh = jnp.maximum(adj_ @ (x_ @ w1), 0.0)
        return adj_ @ (hh @ w_mean), adj_ @ (hh @ w_log_std)

    # --- test 1: small graph -> fused single-kernel path + "new nodes" branch ---
    adj, x = make_graph(k_adj, k_x, n_nodes)
    x_new = jax.random.normal(k_xn, (n_new, features_dim), dtype=jnp.float32)
    outs = jax.block_until_ready(
        recursive_graph_convolution_step(params, adj, x, x_new))

    zm_ref, zls_ref = ref(adj, x)
    zmn_ref, zlsn_ref = ref(jnp.eye(n_new, dtype=jnp.float32), x_new)
    for got, want in zip(outs, (zm_ref, zls_ref, zmn_ref, zlsn_ref)):
        err = float(jnp.max(jnp.abs(got - want)))
        assert jnp.allclose(got, want, atol=5e-2, rtol=5e-2), err

    # --- test 2: force the K-tiled streaming path on a small graph (ragged K) ---
    n_big = 320   # with col_tile=128 the last K block is ragged -> exercises masking
    adj_b, x_b = make_graph(k_adj2, k_x2, n_big)
    zm_b, zls_b = jax.block_until_ready(
        recursive_graph_convolution_step(params, adj_b, x_b,
                                         streaming=True, row_tile=128, col_tile=128))
    zm_bref, zls_bref = ref(adj_b, x_b)
    for got, want in zip((zm_b, zls_b), (zm_bref, zls_bref)):
        err = float(jnp.max(jnp.abs(got - want)))
        assert jnp.allclose(got, want, atol=5e-2, rtol=5e-2), err

    print("KERNEL_OK")
</pallas_src>

<mosaic_0001>
module attributes {stable_mosaic.version = 11 : i64} {
  func.func @_fused_old_kernel(%arg0: memref<16x16xf32, #tpu.memory_space<vmem>>, %arg1: memref<16x32xf32, #tpu.memory_space<vmem>>, %arg2: memref<32x64xf32, #tpu.memory_space<vmem>>, %arg3: memref<64x32xf32, #tpu.memory_space<vmem>>, %arg4: memref<16x32xf32, #tpu.memory_space<vmem>>) attributes {dimension_semantics = [], scalar_prefetch = 0 : i64, scratch_operands = 0 : i64, tpu.core_type = #tpu.core_type<tc>} {
    %c0 = arith.constant 0 : index
    %c0_0 = arith.constant 0 : index
    %0 = vector.load %arg0[%c0, %c0_0] : memref<16x16xf32, #tpu.memory_space<vmem>>, vector<16x16xf32>
    %1 = arith.truncf %0 : vector<16x16xf32> to vector<16x16xbf16>
    %c0_1 = arith.constant 0 : index
    %c0_2 = arith.constant 0 : index
    %2 = vector.load %arg1[%c0_1, %c0_2] : memref<16x32xf32, #tpu.memory_space<vmem>>, vector<16x32xf32>
    %3 = arith.truncf %2 : vector<16x32xf32> to vector<16x32xbf16>
    %c0_3 = arith.constant 0 : index
    %c0_4 = arith.constant 0 : index
    %4 = vector.load %arg2[%c0_3, %c0_4] : memref<32x64xf32, #tpu.memory_space<vmem>>, vector<32x64xf32>
    %5 = arith.truncf %4 : vector<32x64xf32> to vector<32x64xbf16>
    %cst = arith.constant dense<0.000000e+00> : vector<16x64xf32>
    %6 = tpu.matmul %3, %5, %cst {dimension_numbers = #tpu.dot_dimension_numbers<[1], [0], [0], [1], [0, 0, 1, 1], [], []>} : vector<16x32xbf16>, vector<32x64xbf16>, vector<16x64xf32> -> vector<16x64xf32>
    %7 = arith.truncf %6 : vector<16x64xf32> to vector<16x64xbf16>
    %cst_5 = arith.constant dense<0.000000e+00> : vector<16x64xf32>
    %8 = tpu.matmul %1, %7, %cst_5 {dimension_numbers = #tpu.dot_dimension_numbers<[1], [0], [0], [1], [0, 0, 1, 1], [], []>} : vector<16x16xbf16>, vector<16x64xbf16>, vector<16x64xf32> -> vector<16x64xf32>
    %cst_6 = arith.constant 0.000000e+00 : f32
    %9 = vector.broadcast %cst_6 : f32 to vector<16x64xf32>
    %10 = arith.maximumf %8, %9 : vector<16x64xf32>
    %11 = arith.truncf %10 : vector<16x64xf32> to vector<16x64xbf16>
    %c0_7 = arith.constant 0 : index
    %c0_8 = arith.constant 0 : index
    %12 = vector.load %arg3[%c0_7, %c0_8] : memref<64x32xf32, #tpu.memory_space<vmem>>, vector<64x32xf32>
    %13 = arith.truncf %12 : vector<64x32xf32> to vector<64x32xbf16>
    %cst_9 = arith.constant dense<0.000000e+00> : vector<16x32xf32>
    %14 = tpu.matmul %11, %13, %cst_9 {dimension_numbers = #tpu.dot_dimension_numbers<[1], [0], [0], [1], [0, 0, 1, 1], [], []>} : vector<16x64xbf16>, vector<64x32xbf16>, vector<16x32xf32> -> vector<16x32xf32>
    %15 = arith.truncf %14 : vector<16x32xf32> to vector<16x32xbf16>
    %cst_10 = arith.constant dense<0.000000e+00> : vector<16x32xf32>
    %16 = tpu.matmul %1, %15, %cst_10 {dimension_numbers = #tpu.dot_dimension_numbers<[1], [0], [0], [1], [0, 0, 1, 1], [], []>} : vector<16x16xbf16>, vector<16x32xbf16>, vector<16x32xf32> -> vector<16x32xf32>
    %c0_11 = arith.constant 0 : index
    %c0_12 = arith.constant 0 : index
    %17 = vector.load %arg4[%c0_11, %c0_12] : memref<16x32xf32, #tpu.memory_space<vmem>>, vector<16x32xf32>
    tpu.vector_store %arg4[%c0_11, %c0_12], %16 {strides = array<i32>} : memref<16x32xf32, #tpu.memory_space<vmem>>, vector<16x32xf32>,
    return
  }
}

</mosaic_0001>

<bundles_post_ra>
// kernel: tpu_custom_call.1
= control target key start
LH: loop header
LB: loop body
LE: loop exit
PB: predicated region body
PF: predicated region fallthrough
CT: control target
= control target key end

     0   :  { %v319_v3 = vmov 0.0   ;;  %vm320_vm0 = vmmov 0   ;;  %s418_s0 = inlined_call_operand.vmem [shape: f32[16,16], index: 0, kind: input, shape index: {}]   ;;  %s419_s1 = inlined_call_operand.vmem [shape: f32[16,32], index: 1, kind: input, shape index: {}]   ;;  %s420_s2 = inlined_call_operand.vmem [shape: f32[32,64], index: 2, kind: input, shape index: {}]   ;;  %s421_s3 = inlined_call_operand.vmem [shape: f32[64,32], index: 3, kind: input, shape index: {}]   ;;  %s422_s4 = inlined_call_operand.hbm [shape: f32[16,32], index: 4, kind: output, shape index: {}]  }
   0x1   :  { %v25_v0 = vld [vmem:[%s420_s2] sm:$0xff]  ;;  %v26_v1 = vld [vmem:[%s420_s2 + $0x8] sm:$0xff]  ;;  %v27_v2 = vld [vmem:[%s420_s2 + $0x10] sm:$0xff]  ;;  %258 = vmatprep.subr.bf16.mxu0 %v319_v3  ;;  %262 = vmatprep.mubr.msk.bf16.mxu0 %vm320_vm0, %v319_v3 }
   0x2   :  { %v29_v4 = vpack.c.bf16 %v26_v1, %v25_v0  ;;  %v28_v5 = vld [vmem:[%s420_s2 + $0x18] sm:$0xff]  ;;  %266 = vmatprep.subr.bf16.mxu1 %v319_v3  ;;  %268 = vmatprep.mubr.msk.bf16.mxu1 %vm320_vm0, %v319_v3 }
   0x3   :  { %9 = vsyncpa [#allocation3], 0  ;;  %v30_v6 = vpack.c.bf16 %v28_v5, %v27_v2  ;;  %v22_v7 = vld [vmem:[%s419_s1] sm:$0xff]  ;;  %v23_v8 = vld [vmem:[%s419_s1 + $0x8] sm:$0xff]  ;;  %vm31_vm1 = vcmask 261120   ;;  %vm77_vm2 = vcmask 130048  }
   0x4   :  { %259 = vmatpush3.bf16.msra.mxu0 %v29_v4  ;;  %v24_v9 = vpack.c.bf16 %v23_v8, %v22_v7  ;;  %v19_v12 = vld [vmem:[%s418_s0] sm:$0xff]  ;;  %v20_v13 = vld [vmem:[%s418_s0 + $0x8] sm:$0xff]  ;;  %v127_v21 = vld [vmem:[%s421_s3 + $0x10] sm:$0xff]  ;;  %vm137_vm3 = vcmask 523264  }
   0x5   :  { %260 = vmatprep.subr.bf16.mxu0 %v319_v3  ;;  %v125_v15 = vld [vmem:[%s421_s3] sm:$0xff]  ;;  %v126_v16 = vld [vmem:[%s421_s3 + $0x8] sm:$0xff]  ;;  %v21_v19 = vpack.c.bf16 %v20_v13, %v19_v12  ;;  %v128_v22 = vld [vmem:[%s421_s3 + $0x18] sm:$0xff] }
   0x6   :  { %v133_v20 = vpack.c.bf16 %v126_v16, %v125_v15  ;;  %v134_v23 = vpack.c.bf16 %v128_v22, %v127_v21  ;;  %v129_v24 = vld [vmem:[%s421_s3 + $0x20] sm:$0xff]  ;;  %v130_v25 = vld [vmem:[%s421_s3 + $0x28] sm:$0xff]  ;;  %v131_v27 = vld [vmem:[%s421_s3 + $0x30] sm:$0xff] }
   0x7   :  { %v135_v26 = vpack.c.bf16 %v130_v25, %v129_v24  ;;  %v132_v28 = vld [vmem:[%s421_s3 + $0x38] sm:$0xff]  ;;  %s321_s3 = smov [#allocation2]  }
   0x8   :  { %261 = vmatpush3.bf16.msra.mxu0 %v30_v6  ;;  %v136_v29 = vpack.c.bf16 %v132_v28, %v131_v27  ;;  %s231_s18 = sshll.u32 %s321_s3, 4  ;;  %s232_s18 = int_to_ptr.vmem [resolvable:$true] %s231_s18 }
   0x9   :  { %284 = vmatprep.subr.bf16.mxu0 %v319_v3  ;;  %s295_s19 = scalar_lea.vmem %s232_s18, 256  ;;  %p300_p1 = scmp.lt.s32.totalorder %s232_s18, %s232_s18 }
   0xa   :  { %p296_p0 = scmp.ne.s32.totalorder %s232_s18, %s295_s19  ;;  %p301_p2 = scmp.lt.s32.totalorder %s295_s19, %s295_s19 }
   0xb   :  { %263 = vmatmul.mubr.msk.bf16.vlgmr.msra.gmra.mrb[0].mxu0 %vm31_vm1, %v24_v9 }
   0xc   :  { %286 = vmatprep.mubr.msk.bf16.mxu0 %vm320_vm0, %v319_v3  ;;  %p302_p3 = por %p301_p2, %p300_p1 }
   0xe   :  { %p303_p4 = pnand %p302_p3, %p296_p0 }
  0xde   :  { %v69_v10 = vpop.f32.mrb[0].mxu0 }
  0xdf   :  { %v264_v11 = vpop.f32.mrb[1].mxu0 }
  0xe0   :  { %v72_v14 = vpop.f32.mrb[2].mxu0 }
  0xe1   :  { %v76_v17 = vpack.c.bf16 %v72_v14, %v69_v10  ;;  %v265_v18 = vpop.f32.mrb[3].mxu0 }
  0xe3   :  { %267 = vmatpush3.bf16.msra.mxu1 %v76_v17 }
  0xe4   :  { %272 = vmatprep.subr.bf16.mxu1 %v319_v3 }
  0xe6   :  { %269 = vmatmul.mubr.msk.bf16.vlgmr.msra.gmra.mrb[0].mxu1 %vm77_vm2, %v21_v19 }
  0xe7   :  { %273 = vmatpush3.bf16.msra.mxu1 %v133_v20  ;;  %280 = vmatprep.mubr.msk.bf16.mxu1 %vm320_vm0, %v319_v3 }
  0xe8   :  { %274 = vmatprep.subr.bf16.mxu1 %v319_v3 }
  0xeb   :  { %275 = vmatpush3.bf16.msra.mxu1 %v134_v23 }
  0xec   :  { %276 = vmatprep.subr.bf16.mxu1 %v319_v3 }
  0xef   :  { %277 = vmatpush3.bf16.msra.mxu1 %v135_v26 }
  0xf0   :  { %278 = vmatprep.subr.bf16.mxu1 %v319_v3 }
  0xf3   :  { %279 = vmatpush3.bf16.msra.mxu1 %v136_v29 }
 0x1b9   :  { %v115_v30 = vpop.f32.mrb[0].mxu1 }
 0x1ba   :  { %v270_v31 = vpop.f32.mrb[1].mxu1  ;;  %v122_v33 = vmax.f32 %v115_v30, 0.0 }
 0x1bb   :  { %v118_v32 = vpop.f32.mrb[2].mxu1 }
 0x1bc   :  { %v123_v34 = vmax.f32 %v118_v32, 0.0  ;;  %v271_v35 = vpop.f32.mrb[3].mxu1 }
 0x1be   :  { %v124_v36 = vpack.c.bf16 %v123_v34, %v122_v33 }
 0x1c0   :  { %281 = vmatmul.mubr.msk.bf16.vlgmr.msra.gmra.mrb[4].mxu1 %vm137_vm3, %v124_v36 }
 0x293   :  { %v175_v37 = vpop.f32.mrb[4].mxu1 }
 0x294   :  { %v282_v38 = vpop.f32.mrb[5].mxu1 }
 0x295   :  { %v178_v39 = vpop.f32.mrb[6].mxu1 }
 0x296   :  { %v182_v40 = vpack.c.bf16 %v178_v39, %v175_v37  ;;  %v283_v41 = vpop.f32.mrb[7].mxu1 }
 0x298   :  { %285 = vmatpush3.bf16.msra.mxu0 %v182_v40 }
 0x29b   :  { %287 = vmatmul.mubr.msk.bf16.vlgmr.msra.gmra.mrb[4].mxu0 %vm77_vm2, %v21_v19 }
 0x36e   :  { %v217_v42 = vpop.f32.mrb[4].mxu0 }
 0x36f   :  { %224 = vst.msk [vmem:[#allocation2] sm:$0xff] %vm31_vm1, %v217_v42  ;;  %v288_v43 = vpop.f32.mrb[5].mxu0 }
 0x370   :  { %v220_v44 = vpop.f32.mrb[6].mxu0 }
 0x371   :  { %225 = vst.msk [vmem:[#allocation2 + $0x8] sm:$0xff] %vm31_vm1, %v220_v44  ;;  %v289_v45 = vpop.f32.mrb[7].mxu0 }
 0x372   :  { %306 = shalt.err (!%p303_p4)
}
 0x373   :  { %s307_s22 = scalar_lea.hbm %s422_s4, 256 }
 0x374   :  { %p308_p5 = scmp.ne.s32.totalorder %s422_s4, %s307_s22  ;;  %p311_p6 = scmp.lt.u32.totalorder %s307_s22, %s422_s4 }
 0x376   :  { %p313_p7 = pnand %p311_p6, %p308_p5 }
 0x378   :  { %316 = shalt.err (!%p313_p7)
}
 0x379   :  { %s322_s2 = smov 128   ;;  %s323_s27 = smov 8  }
 0x37a   :  { %237 = dma.vmem_to_hbm [thread:$0]  %s232_s18, 256, %s422_s4, [#allocation3], %s322_s2, %s322_s2, %s323_s27  }
 0x37b   :  { %317 = dma.done.wait [#allocation3], 256  }
 0x37c   :  { %318 = vsyncadd [#allocation3], 4294967040 }
 0x37d   :  { %241 = vsyncpa [#allocation3], 1 }

</bundles_post_ra>
